<compile_context>
chip_gen: v7x
topology: tpu7x:2x2x1
jax: 0.10.0
libtpu: 0.0.40
codegen_flags: <defaults>
</compile_context>

<pallas_src>
import functools

import jax
import jax.numpy as jnp
from jax.experimental import pallas as pl
from jax.experimental.pallas import tpu as pltpu


def _round_up(x, m):
    return (x + m - 1) // m * m


def _logits(x, w01_ref, b01_ref, w2_ref, b2_ref):
    """Folded MLP: relu(x @ W01 + b01) @ W2^T + b2 (f32 MXU accumulation)."""
    h = jnp.dot(x, w01_ref[...], preferred_element_type=jnp.float32) + b01_ref[...]
    h = jnp.maximum(h, 0.0)
    return jnp.dot(h, w2_ref[...], preferred_element_type=jnp.float32) + b2_ref[...]


# ----------------------- fast path: whole batch in one tile -----------------------

def _single_tile_kernel(x_ref, w01_ref, b01_ref, w2_ref, b2_ref, out_ref, *, batch):
    logits = _logits(x_ref[...], w01_ref, b01_ref, w2_ref, b2_ref)
    # Padded batch rows must not contribute to the dim=0 (batch-axis) softmax stats.
    row_ids = jax.lax.broadcasted_iota(jnp.int32, (logits.shape[0], 1), 0)
    masked = jnp.where(row_ids < batch, logits, -jnp.inf)
    m = jnp.max(masked, axis=0, keepdims=True)                    # (1, out_f)
    l = jnp.sum(jnp.exp(masked - m), axis=0, keepdims=True)       # (1, out_f)
    out_ref[...] = jnp.exp(logits - m) * (1.0 / l)


# -------- multi-tile path: parallel stats pass + XLA combine + parallel normalize --------

def _stats_kernel(x_ref, w01_ref, b01_ref, w2_ref, b2_ref, pmax_ref, psum_ref,
                  *, batch, tile_b):
    j = pl.program_id(0)
    logits = _logits(x_ref[...], w01_ref, b01_ref, w2_ref, b2_ref)
    row_ids = jax.lax.broadcasted_iota(jnp.int32, (tile_b, 1), 0) + j * tile_b
    masked = jnp.where(row_ids < batch, logits, -jnp.inf)
    m_j = jnp.max(masked, axis=0, keepdims=True)                  # (1, out_f)
    l_j = jnp.sum(jnp.exp(masked - m_j), axis=0, keepdims=True)   # (1, out_f)
    # Partial-stat outputs carry an 8-row sublane pad so the (8,128) block rule holds.
    pmax_ref[...] = jnp.broadcast_to(m_j[None, :, :], pmax_ref.shape)
    psum_ref[...] = jnp.broadcast_to(l_j[None, :, :], psum_ref.shape)


def _normalize_kernel(x_ref, w01_ref, b01_ref, w2_ref, b2_ref, m_ref, invl_ref, out_ref):
    logits = _logits(x_ref[...], w01_ref, b01_ref, w2_ref, b2_ref)
    out_ref[...] = jnp.exp(logits - m_ref[...]) * invl_ref[...]


# ----------------------------------- wrapper -----------------------------------

def neural_network_forward(x, params, *, tile_b=None):
    """x: [B, 32] float32.  params: dict name -> (W [out,in], b [out])."""
    w0, b0 = params["input"]
    w1, b1 = params["linear1"]
    w2, b2 = params["output"]

    B, in_f = x.shape
    h1_f = w1.shape[0]
    out_f = w2.shape[0]

    # Fold the two activation-free leading Linear layers (one-time 32x64x64 fold).
    w0t = w0.T.astype(jnp.float32)
    w1t = w1.T.astype(jnp.float32)
    w01 = w0t @ w1t                                                      # (in_f, h1_f)
    b01 = (b0.astype(jnp.float32) @ w1t + b1.astype(jnp.float32))[None]  # (1, h1_f)
    w2t = w2.T.astype(jnp.float32)                                       # (h1_f, out_f)
    b2r = b2.astype(jnp.float32)[None, :]                                # (1, out_f)

    # Batch tiling: multiple of 8 (f32 sublanes).  See VMEM budget note in header.
    if tile_b is None:
        tile_b = min(8192, _round_up(B, 8))
    else:
        tile_b = _round_up(tile_b, 8)
    b_pad = _round_up(B, tile_b)
    xp = x.astype(jnp.float32)
    if b_pad != B:
        xp = jnp.zeros((b_pad, in_f), jnp.float32).at[:B, :].set(xp)
    nb = b_pad // tile_b

    resident = lambda j: (0, 0)  # weights/biases stay VMEM-resident across the grid
    weight_bytes = 4 * (in_f * h1_f + h1_f + h1_f * out_f + out_f)
    pass_flops = 2 * b_pad * (in_f * h1_f + h1_f * out_f)

    if nb == 1:
        # Single-pass dim=0 softmax; whole (padded) batch is one tile.
        out = pl.pallas_call(
            functools.partial(_single_tile_kernel, batch=B),
            out_shape=jax.ShapeDtypeStruct((b_pad, out_f), jnp.float32),
            grid_spec=pltpu.PrefetchScalarGridSpec(
                num_scalar_prefetch=0,
                grid=(1,),
                in_specs=[
                    pl.BlockSpec((b_pad, in_f), resident),   # x (full)
                    pl.BlockSpec((in_f, h1_f), resident),    # W01
                    pl.BlockSpec((1, h1_f), resident),       # b01
                    pl.BlockSpec((h1_f, out_f), resident),   # W2^T
                    pl.BlockSpec((1, out_f), resident),      # b2
                ],
                out_specs=pl.BlockSpec((b_pad, out_f), resident),
            ),
            compiler_params=pltpu.CompilerParams(
                dimension_semantics=("arbitrary",)),
            cost_estimate=pl.CostEstimate(
                flops=pass_flops,
                transcendentals=2 * b_pad * out_f,
                bytes_accessed=4 * b_pad * (in_f + out_f) + weight_bytes),
        )(xp, w01, b01, w2t, b2r)
        return out[:B]

    # Pass 1: per-tile column max / sum-exp partials (batch axis fully parallel).
    pmax_p, psum_p = pl.pallas_call(
        functools.partial(_stats_kernel, batch=B, tile_b=tile_b),
        out_shape=(jax.ShapeDtypeStruct((nb, 8, out_f), jnp.float32),
                   jax.ShapeDtypeStruct((nb, 8, out_f), jnp.float32)),
        grid_spec=pltpu.PrefetchScalarGridSpec(
            num_scalar_prefetch=0,
            grid=(nb,),
            in_specs=[
                pl.BlockSpec((tile_b, in_f), lambda j: (j, 0)),   # x: stream batch tiles
                pl.BlockSpec((in_f, h1_f), resident),             # W01
                pl.BlockSpec((1, h1_f), resident),                # b01
                pl.BlockSpec((h1_f, out_f), resident),            # W2^T
                pl.BlockSpec((1, out_f), resident),               # b2
            ],
            out_specs=[pl.BlockSpec((1, 8, out_f), lambda j: (j, 0, 0)),
                       pl.BlockSpec((1, 8, out_f), lambda j: (j, 0, 0))],
        ),
        compiler_params=pltpu.CompilerParams(
            dimension_semantics=("parallel",)),   # megacore-shardable on v7x
        cost_estimate=pl.CostEstimate(
            flops=pass_flops,
            transcendentals=b_pad * out_f,
            bytes_accessed=4 * (b_pad * in_f + 2 * nb * 8 * out_f) + weight_bytes),
    )(xp, w01, b01, w2t, b2r)

    # Tiny XLA combine of the per-tile partial softmax statistics.
    pmax = pmax_p[:, 0, :]                                           # (nb, out_f)
    psum = psum_p[:, 0, :]                                           # (nb, out_f)
    m = jnp.max(pmax, axis=0, keepdims=True)                         # (1, out_f)
    inv_l = 1.0 / jnp.sum(psum * jnp.exp(pmax - m), axis=0, keepdims=True)

    # Pass 2: recompute logits per tile and normalize (batch axis fully parallel).
    out = pl.pallas_call(
        _normalize_kernel,
        out_shape=jax.ShapeDtypeStruct((b_pad, out_f), jnp.float32),
        grid_spec=pltpu.PrefetchScalarGridSpec(
            num_scalar_prefetch=0,
            grid=(nb,),
            in_specs=[
                pl.BlockSpec((tile_b, in_f), lambda j: (j, 0)),
                pl.BlockSpec((in_f, h1_f), resident),
                pl.BlockSpec((1, h1_f), resident),
                pl.BlockSpec((h1_f, out_f), resident),
                pl.BlockSpec((1, out_f), resident),
                pl.BlockSpec((1, out_f), resident),   # global column max
                pl.BlockSpec((1, out_f), resident),   # 1 / global column sum-exp
            ],
            out_specs=pl.BlockSpec((tile_b, out_f), lambda j: (j, 0)),
        ),
        compiler_params=pltpu.CompilerParams(
            dimension_semantics=("parallel",)),
        cost_estimate=pl.CostEstimate(
            flops=pass_flops,
            transcendentals=b_pad * out_f,
            bytes_accessed=4 * b_pad * (in_f + out_f) + weight_bytes),
    )(xp, w01, b01, w2t, b2r, m, inv_l)
    return out[:B]


# --------------------------------- test harness ---------------------------------

def init_params(key):
    """Deterministic PyTorch-style Linear init: U(-1/sqrt(fan_in), 1/sqrt(fan_in))."""
    sizes = {
        "input": (32, 64),    # (in_features, out_features)
        "linear1": (64, 64),
        "output": (64, 16),
    }
    params = {}
    for name, (fin, fout) in sizes.items():
        key, kw, kb = jax.random.split(key, 3)
        bound = 1.0 / jnp.sqrt(jnp.float32(fin))
        W = jax.random.uniform(kw, (fout, fin), jnp.float32, -bound, bound)
        b = jax.random.uniform(kb, (fout,), jnp.float32, -bound, bound)
        params[name] = (W, b)
    return params


def reference_forward(x, params):
    """Pure-JAX reference of the same forward pass (unfolded, f32)."""
    w0, b0 = params["input"]
    w1, b1 = params["linear1"]
    w2, b2 = params["output"]
    h0 = x @ w0.T + b0
    h1 = jnp.maximum(h0 @ w1.T + b1, 0.0)
    logits = h1 @ w2.T + b2
    return jax.nn.softmax(logits, axis=0)  # dim=0 softmax, matching the module


if __name__ == "__main__":
    key = jax.random.PRNGKey(0)
    kp, kx1, kx2 = jax.random.split(key, 3)
    params = init_params(kp)

    # Fast path: B <= tile_b -> single-pass kernel.
    x_small = jax.random.normal(kx1, (8, 32), jnp.float32)
    out_small = jax.block_until_ready(neural_network_forward(x_small, params))
    ref_small = reference_forward(x_small, params)
    assert out_small.shape == (8, 16)
    # W0*W1 fold changes f32 summation order slightly -> small tolerance.
    assert jnp.allclose(out_small, ref_small, atol=1e-4, rtol=1e-4), "fast path mismatch"

    # Multi-tile path (tile_b forced small): parallel stats + combine + normalize,
    # with a partially padded last tile.
    x_big = jax.random.normal(kx2, (40, 32), jnp.float32)
    out_big = jax.block_until_ready(neural_network_forward(x_big, params, tile_b=16))
    ref_big = reference_forward(x_big, params)
    assert out_big.shape == (40, 16)
    assert jnp.allclose(out_big, ref_big, atol=1e-4, rtol=1e-4), "multi-tile mismatch"

    print("KERNEL_OK")
</pallas_src>

<mosaic_0001>
module attributes {stable_mosaic.version = 11 : i64} {
  func.func @_single_tile_kernel(%arg0: i32, %arg1: memref<8x32xf32, #tpu.memory_space<vmem>>, %arg2: memref<32x64xf32, #tpu.memory_space<vmem>>, %arg3: memref<1x64xf32, #tpu.memory_space<vmem>>, %arg4: memref<64x16xf32, #tpu.memory_space<vmem>>, %arg5: memref<1x16xf32, #tpu.memory_space<vmem>>, %arg6: memref<8x16xf32, #tpu.memory_space<vmem>>) attributes {dimension_semantics = [#tpu.dimension_semantics<arbitrary>], iteration_bounds = array<i64: 1>, scalar_prefetch = 0 : i64, scratch_operands = 0 : i64, tpu.core_type = #tpu.core_type<tc>, window_params = [{pipeline_mode = #tpu.pipeline_mode<synchronous>, transform_indices = @transform_0, window_bounds = array<i64: 8, 32>}, {pipeline_mode = #tpu.pipeline_mode<synchronous>, transform_indices = @transform_1, window_bounds = array<i64: 32, 64>}, {pipeline_mode = #tpu.pipeline_mode<synchronous>, transform_indices = @transform_2, window_bounds = array<i64: 1, 64>}, {pipeline_mode = #tpu.pipeline_mode<synchronous>, transform_indices = @transform_3, window_bounds = array<i64: 64, 16>}, {pipeline_mode = #tpu.pipeline_mode<synchronous>, transform_indices = @transform_4, window_bounds = array<i64: 1, 16>}, {pipeline_mode = #tpu.pipeline_mode<synchronous>, transform_indices = @transform_5, window_bounds = array<i64: 8, 16>}]} {
    %c0 = arith.constant 0 : index
    %c0_0 = arith.constant 0 : index
    %0 = vector.load %arg1[%c0, %c0_0] : memref<8x32xf32, #tpu.memory_space<vmem>>, vector<8x32xf32>
    %c0_1 = arith.constant 0 : index
    %c0_2 = arith.constant 0 : index
    %1 = vector.load %arg2[%c0_1, %c0_2] : memref<32x64xf32, #tpu.memory_space<vmem>>, vector<32x64xf32>
    %cst = arith.constant dense<0.000000e+00> : vector<8x64xf32>
    %2 = tpu.matmul %0, %1, %cst {dimension_numbers = #tpu.dot_dimension_numbers<[1], [0], [0], [1], [0, 0, 1, 1], [], []>} : vector<8x32xf32>, vector<32x64xf32>, vector<8x64xf32> -> vector<8x64xf32>
    %c0_3 = arith.constant 0 : index
    %c0_4 = arith.constant 0 : index
    %3 = vector.load %arg3[%c0_3, %c0_4] : memref<1x64xf32, #tpu.memory_space<vmem>>, vector<1x64xf32>
    %4 = vector.broadcast %3 : vector<1x64xf32> to vector<8x64xf32>
    %5 = arith.addf %2, %4 : vector<8x64xf32>
    %cst_5 = arith.constant 0.000000e+00 : f32
    %6 = vector.broadcast %cst_5 : f32 to vector<8x64xf32>
    %7 = arith.maximumf %5, %6 : vector<8x64xf32>
    %c0_6 = arith.constant 0 : index
    %c0_7 = arith.constant 0 : index
    %8 = vector.load %arg4[%c0_6, %c0_7] : memref<64x16xf32, #tpu.memory_space<vmem>>, vector<64x16xf32>
    %cst_8 = arith.constant dense<0.000000e+00> : vector<8x16xf32>
    %9 = tpu.matmul %7, %8, %cst_8 {dimension_numbers = #tpu.dot_dimension_numbers<[1], [0], [0], [1], [0, 0, 1, 1], [], []>} : vector<8x64xf32>, vector<64x16xf32>, vector<8x16xf32> -> vector<8x16xf32>
    %c0_9 = arith.constant 0 : index
    %c0_10 = arith.constant 0 : index
    %10 = vector.load %arg5[%c0_9, %c0_10] : memref<1x16xf32, #tpu.memory_space<vmem>>, vector<1x16xf32>
    %11 = vector.broadcast %10 : vector<1x16xf32> to vector<8x16xf32>
    %12 = arith.addf %9, %11 : vector<8x16xf32>
    %13 = tpu.iota {dimensions = array<i32: 0>} : vector<8x1xi32>
    %c8_i32 = arith.constant 8 : i32
    %14 = vector.broadcast %c8_i32 : i32 to vector<8x1xi32>
    %15 = arith.cmpi slt, %13, %14 : vector<8x1xi32>
    %cst_11 = arith.constant 0xFF800000 : f32
    %16 = vector.shape_cast %15 : vector<8x1xi1> to vector<8x1xi1>
    %17 = vector.broadcast %16 : vector<8x1xi1> to vector<8x16xi1>
    %18 = vector.broadcast %cst_11 : f32 to vector<8x16xf32>
    %19 = arith.select %17, %12, %18 : vector<8x16xi1>, vector<8x16xf32>
    %cst_12 = arith.constant dense<0xFF800000> : vector<16xf32>
    %20 = vector.multi_reduction <maximumf>, %19, %cst_12 [0] : vector<8x16xf32> to vector<16xf32>
    %21 = vector.shape_cast %20 : vector<16xf32> to vector<1x16xf32>
    %22 = vector.broadcast %21 : vector<1x16xf32> to vector<8x16xf32>
    %23 = arith.subf %19, %22 : vector<8x16xf32>
    %24 = math.exp %23 : vector<8x16xf32>
    %cst_13 = arith.constant dense<0.000000e+00> : vector<16xf32>
    %25 = vector.multi_reduction <add>, %24, %cst_13 [0] : vector<8x16xf32> to vector<16xf32>
    %26 = vector.shape_cast %25 : vector<16xf32> to vector<1x16xf32>
    %27 = vector.broadcast %21 : vector<1x16xf32> to vector<8x16xf32>
    %28 = arith.subf %12, %27 : vector<8x16xf32>
    %29 = math.exp %28 : vector<8x16xf32>
    %cst_14 = arith.constant 1.000000e+00 : f32
    %30 = vector.broadcast %cst_14 : f32 to vector<1x16xf32>
    %31 = arith.divf %30, %26 : vector<1x16xf32>
    %32 = vector.broadcast %31 : vector<1x16xf32> to vector<8x16xf32>
    %33 = arith.mulf %29, %32 : vector<8x16xf32>
    %c0_15 = arith.constant 0 : index
    %c0_16 = arith.constant 0 : index
    %34 = vector.load %arg6[%c0_15, %c0_16] : memref<8x16xf32, #tpu.memory_space<vmem>>, vector<8x16xf32>
    tpu.vector_store %arg6[%c0_15, %c0_16], %33 {strides = array<i32>} : memref<8x16xf32, #tpu.memory_space<vmem>>, vector<8x16xf32>,
    return
  }
  func.func @transform_0(%arg0: i32) -> (i32, i32) {
    %c0_i32 = arith.constant 0 : i32
    %c0_i32_0 = arith.constant 0 : i32
    %c0_i32_1 = arith.constant 0 : i32
    return %c0_i32, %c0_i32_0 : i32, i32
  }
  func.func @transform_1(%arg0: i32) -> (i32, i32) {
    %c0_i32 = arith.constant 0 : i32
    %c0_i32_0 = arith.constant 0 : i32
    %c0_i32_1 = arith.constant 0 : i32
    return %c0_i32, %c0_i32_0 : i32, i32
  }
  func.func @transform_2(%arg0: i32) -> (i32, i32) {
    %c0_i32 = arith.constant 0 : i32
    %c0_i32_0 = arith.constant 0 : i32
    %c0_i32_1 = arith.constant 0 : i32
    return %c0_i32, %c0_i32_0 : i32, i32
  }
  func.func @transform_3(%arg0: i32) -> (i32, i32) {
    %c0_i32 = arith.constant 0 : i32
    %c0_i32_0 = arith.constant 0 : i32
    %c0_i32_1 = arith.constant 0 : i32
    return %c0_i32, %c0_i32_0 : i32, i32
  }
  func.func @transform_4(%arg0: i32) -> (i32, i32) {
    %c0_i32 = arith.constant 0 : i32
    %c0_i32_0 = arith.constant 0 : i32
    %c0_i32_1 = arith.constant 0 : i32
    return %c0_i32, %c0_i32_0 : i32, i32
  }
  func.func @transform_5(%arg0: i32) -> (i32, i32) {
    %c0_i32 = arith.constant 0 : i32
    %c0_i32_0 = arith.constant 0 : i32
    %c0_i32_1 = arith.constant 0 : i32
    return %c0_i32, %c0_i32_0 : i32, i32
  }
}

</mosaic_0001>

<bundles_post_ra>
// kernel: tpu_custom_call.1
= control target key start
LH: loop header
LB: loop body
LE: loop exit
PB: predicated region body
PF: predicated region fallthrough
CT: control target
= control target key end

     0   :  { %v340_v3 = vmov 0.0|0.0   ;;  %vm341_vm0 = vmmov 0   ;;  %v342_v6 = vmov 0.0   ;;  %s434_s0 = inlined_call_operand.vmem [shape: f32[8,32], index: 0, kind: input, shape index: {}]   ;;  %s435_s1 = inlined_call_operand.vmem [shape: f32[32,64], index: 1, kind: input, shape index: {}]   ;;  %s436_s2 = inlined_call_operand.vmem [shape: f32[1,64], index: 2, kind: input, shape index: {}]   ;;  %s437_s3 = inlined_call_operand.vmem [shape: f32[64,16], index: 3, kind: input, shape index: {}]   ;;  %s438_s4 = inlined_call_operand.vmem [shape: f32[1,16], index: 4, kind: input, shape index: {}]   ;;  %s439_s5 = inlined_call_operand.hbm [shape: f32[8,16], index: 5, kind: output, shape index: {}]  }
   0x1   :  { %v22_v0 = vld [vmem:[%s435_s1] sm:$0xff]  ;;  %v23_v1 = vld [vmem:[%s435_s1 + $0x8] sm:$0xff]  ;;  %v24_v2 = vld [vmem:[%s435_s1 + $0x10] sm:$0xff]  ;;  %290 = vmatprep.subr.bf16.mxu0 %v340_v3  ;;  %268 = vmatprep.mubr.msk.f32.mxu0 %vm341_vm0, %v342_v6 }
   0x2   :  { %v291_v4 = vpack.c.bf16 %v23_v1, %v22_v0  ;;  %v25_v5 = vld [vmem:[%s435_s1 + $0x18] sm:$0xff]  ;;  %v108_v7 = vld [vmem:[%s437_s3] sm:$0xff]  ;;  %296 = vmatprep.subr.bf16.mxu1 %v340_v3  ;;  %v109_v8 = vld [vmem:[%s437_s3 + $0x8] sm:$0xff]  ;;  %287 = vmatprep.mubr.msk.f32.mxu1 %vm341_vm0, %v342_v6 }
   0x3   :  { %v110_v9 = vld [vmem:[%s437_s3 + $0x10] sm:$0xff]  ;;  %v111_v10 = vld [vmem:[%s437_s3 + $0x18] sm:$0xff]  ;;  %v294_v11 = vpack.c.bf16 %v25_v5, %v24_v2  ;;  %v297_v12 = vpack.c.bf16 %v109_v8, %v108_v7 }
   0x4   :  { %292 = vmatpush3.bf16.msra.mxu0 %v291_v4 }
   0x5   :  { %293 = vmatprep.subr.bf16.mxu0 %v340_v3 }
   0x6   :  { %10 = vsyncpa [#allocation3], 0  ;;  %298 = vmatpush3.bf16.msra.mxu1 %v297_v12  ;;  %v300_v13 = vpack.c.bf16 %v111_v10, %v110_v9  ;;  %v112_v14 = vld [vmem:[%s437_s3 + $0x20] sm:$0xff]  ;;  %v113_v15 = vld [vmem:[%s437_s3 + $0x28] sm:$0xff]  ;;  %vm33_vm1 = vcmask 261120   ;;  %vm123_vm2 = vcmask 523264  }
   0x7   :  { %299 = vmatprep.subr.bf16.mxu1 %v340_v3  ;;  %v21_v16 = vld [vmem:[%s434_s0] sm:$0xff]  ;;  %v303_v17 = vpack.c.bf16 %v113_v15, %v112_v14  ;;  %v114_v18 = vld [vmem:[%s437_s3 + $0x30] sm:$0xff]  ;;  %v115_v19 = vld [vmem:[%s437_s3 + $0x38] sm:$0xff]  ;;  %vm203_vm3 = vcmask 130048  }
   0x8   :  { %295 = vmatpush3.bf16.msra.mxu0 %v294_v11  ;;  %v306_v20 = vpack.c.bf16 %v115_v19, %v114_v18  ;;  %v242_v21 = vld [vmem:[%s436_s2] ss:$0 sm:$0xff]  ;;  %s343_s2 = smov [#allocation2]  }
   0x9   :  { %v244_v26 = vld [vmem:[%s438_s4] ss:$0 sm:$0xff]  ;;  %s234_s3 = sshll.u32 %s343_s2, 4  ;;  %s235_s3 = int_to_ptr.vmem [resolvable:$true] %s234_s3 }
   0xa   :  { %301 = vmatpush3.bf16.msra.mxu1 %v300_v13  ;;  %s316_s4 = scalar_lea.vmem %s235_s3, 128  ;;  %p321_p1 = scmp.lt.s32.totalorder %s235_s3, %s235_s3 }
   0xb   :  { %269 = vmatmul.mubr.msk.f32.vlgmr.msra.gmra.mrb[0].mxu0 %vm33_vm1, %v21_v16  ;;  %302 = vmatprep.subr.bf16.mxu1 %v340_v3  ;;  %p317_p0 = scmp.ne.s32.totalorder %s235_s3, %s316_s4  ;;  %p322_p2 = scmp.lt.s32.totalorder %s316_s4, %s316_s4 }
   0xd   :  { %p323_p3 = por %p322_p2, %p321_p1 }
   0xe   :  { %304 = vmatpush3.bf16.msra.mxu1 %v303_v17 }
   0xf   :  { %305 = vmatprep.subr.bf16.mxu1 %v340_v3  ;;  %p324_p4 = pnand %p323_p3, %p317_p0 }
  0x12   :  { %307 = vmatpush3.bf16.msra.mxu1 %v306_v20 }
  0xde   :  { %v103_v22 = vpop.f32.mrb[0].mxu0 }
  0xdf   :  { %v104_v23 = vadd.f32 %v242_v21, %v103_v22  ;;  %v270_v24 = vpop.f32.mrb[1].mxu0 }
  0xe1   :  { %v107_v25 = vmax.f32 %v104_v23, 0.0 }
  0xe3   :  { %288 = vmatmul.mubr.msk.f32.vlgmr.msra.gmra.mrb[0].mxu1 %vm123_vm2, %v107_v25 }
 0x1b6   :  { %v193_v27 = vpop.f32.mrb[0].mxu1 }
 0x1b7   :  { %v194_v28 = vadd.f32 %v244_v26, %v193_v27  ;;  %v289_v29 = vpop.f32.mrb[1].mxu1 }
 0x1b9   :  { %v204_v30 = vsel %vm203_vm3, %v194_v28, -inf }
 0x1ba   :  { %v205_v31 = vrot.slane %v204_v30, 4 }
 0x1bc   :  { %v206_v32 = vmax.f32 %v204_v30, %v205_v31 }
 0x1be   :  { %v207_v33 = vrot.slane %v206_v32, 2 }
 0x1c0   :  { %v208_v34 = vmax.f32 %v206_v32, %v207_v33 }
 0x1c2   :  { %v209_v35 = vrot.slane %v208_v34, 1 }
 0x1c4   :  { %v210_v36 = vmax.f32 %v208_v34, %v209_v35 }
 0x1c6   :  { %v211_v37 = vsub.f32 %v194_v28, %v210_v36 }
 0x1c8   :  { %v212_v38 = vmul.f32 1.442695, %v211_v37 }
 0x1ca   :  { %312 = vpow2.f32 %v212_v38 }
 0x1d4   :  { %v313_v39 = vpop.eup %312 }
 0x1d5   :  { %v214_v40 = vsel %vm203_vm3, %v313_v39, 0.0 }
 0x1d6   :  { %v215_v41 = vrot.slane %v214_v40, 4 }
 0x1d8   :  { %v216_v42 = vadd.f32 %v215_v41, %v214_v40 }
 0x1da   :  { %v217_v43 = vrot.slane %v216_v42, 2 }
 0x1dc   :  { %v218_v44 = vadd.f32 %v217_v43, %v216_v42 }
 0x1de   :  { %v219_v45 = vrot.slane %v218_v44, 1 }
 0x1e0   :  { %v220_v46 = vadd.f32 %v219_v45, %v218_v44 }
 0x1e2   :  { %314 = vrcp.f32 %v220_v46 }
 0x1ec   :  { %v315_v47 = vpop.eup %314 }
 0x1ed   :  { %v226_v48 = vmul.f32 %v315_v47, %v313_v39 }
 0x1ef   :  { %227 = vst.msk [vmem:[#allocation2] sm:$0xff] %vm203_vm3, %v226_v48 }
 0x1f0   :  { %327 = shalt.err (!%p324_p4)
}
 0x1f1   :  { %s328_s23 = scalar_lea.hbm %s439_s5, 128 }
 0x1f2   :  { %p329_p5 = scmp.ne.s32.totalorder %s439_s5, %s328_s23  ;;  %p332_p6 = scmp.lt.u32.totalorder %s328_s23, %s439_s5 }
 0x1f4   :  { %p334_p7 = pnand %p332_p6, %p329_p5 }
 0x1f6   :  { %337 = shalt.err (!%p334_p7)
}
 0x1f7   :  { %237 = dma.vmem_to_hbm [thread:$0]  %s235_s3, 128, %s439_s5, [#allocation3]  }
 0x1f8   :  { %338 = dma.done.wait [#allocation3], 128  }
 0x1f9   :  { %339 = vsyncadd [#allocation3], 4294967168 }
 0x1fa   :  { %241 = vsyncpa [#allocation3], 1 }

</bundles_post_ra>
